<compile_context>
chip_gen: v5e
topology: v5e:2x2
jax: 0.10.0
libtpu: 0.0.40
codegen_flags: <defaults>
</compile_context>

<pallas_src>
import functools

import jax
import jax.numpy as jnp
from jax.experimental import pallas as pl
from jax.experimental.pallas import tpu as pltpu


def _dyn_edgeconv_kernel(xq_ref, qsq_ref, xa_ref, xat_ref, nsq_ref,
                         wd_ref, w2_ref, b_ref, out_ref,
                         *, n_valid, k, dilation):
    """xq_ref:  (TN, C)   query-node tile
       qsq_ref: (TN, 1)   precomputed ||x_i||^2 for the tile
       xa_ref:  (NP, C)   all (padded) nodes (gather source)
       xat_ref: (C, NP)   all nodes, transposed (distance matmul RHS)
       nsq_ref: (1, NP)   precomputed ||x_j||^2 for all nodes
       wd_ref:  (C, CO)   W1 - W2   (x_i path of the concat Linear)
       w2_ref:  (C, CO)   W2        (x_j path of the concat Linear)
       b_ref:   (1, CO)   Linear bias
       out_ref: (TN, CO)  max-aggregated, ReLU'd node features."""
    f32 = jnp.float32
    xq = xq_ref[...].astype(f32)           # (TN, C)
    tn, c = xq.shape
    np_ = xa_ref.shape[0]
    co = out_ref.shape[1]

    # Query-side projection (MXU, f32 accumulate).
    base = jnp.dot(xq, wd_ref[...], preferred_element_type=f32) + b_ref[...]  # (TN, CO)

    # Pairwise squared distances: ||xq||^2 + ||xa||^2 - 2 xq.xa
    # (default MXU f32 precision; reference uses HIGHEST -- near-tie neighbor
    #  selection could differ for adversarial inputs, fine for generic data).
    cross = jnp.dot(xq, xat_ref[...], preferred_element_type=f32)             # (TN, NP)
    dist = qsq_ref[...] + nsq_ref[...] - 2.0 * cross                          # (TN, NP)

    # Mask self-edges and padded candidate columns.
    qid = (pl.program_id(0) * tn
           + jax.lax.broadcasted_iota(jnp.int32, (tn, np_), 0))
    cid = jax.lax.broadcasted_iota(jnp.int32, (tn, np_), 1)
    invalid = jnp.logical_or(cid == qid, cid >= n_valid)
    dist = jnp.where(invalid, jnp.inf, dist)

    xa = xa_ref[...].astype(f32)           # (NP, C)
    w2 = w2_ref[...].astype(f32)           # (C, CO)

    def extract_min(d):
        # One-hot of the row-wise nearest remaining candidate (first-index
        # tie-break, matching lax.top_k), plus the updated (masked) distances.
        row_min = jnp.min(d, axis=1, keepdims=True)                           # (TN, 1)
        is_min = d == row_min
        first = jnp.min(jnp.where(is_min, cid, np_), axis=1, keepdims=True)   # (TN, 1)
        pick = cid == first                                                   # one-hot bool
        return pick, jnp.where(pick, jnp.inf, d)

    def body(_, carry):
        d, agg = carry
        pick, d = extract_min(d)
        # Two-stage gather: one-hot row-select of raw features, then project.
        xj = jnp.dot(pick.astype(f32), xa, preferred_element_type=f32)        # (TN, C)
        zj = jnp.dot(xj, w2, preferred_element_type=f32)                      # (TN, CO)
        agg = jnp.maximum(agg, zj)
        # DilatedKnnGraph keeps every d-th neighbor: skip the next d-1 ranks.
        for _unused in range(dilation - 1):
            pick, d = extract_min(d)
        return d, agg

    agg0 = jnp.full((tn, co), -jnp.inf, f32)
    _, agg = jax.lax.fori_loop(0, k, body, (dist, agg0))

    # ReLU is monotone, so max_j ReLU(base + z_j) == ReLU(base + max_j z_j).
    out_ref[...] = jnp.maximum(base + agg, 0.0).astype(out_ref.dtype)


def _vmem_limit_bytes():
    """Per-generation VMEM budget: ~3/4 of physical, capped at 112 MiB.
    -> ~96 MiB on v5e/v6e (128 MiB physical), ~48 MiB on v7x (64 MiB)."""
    try:
        cap = int(pltpu.get_tpu_info().vmem_capacity_bytes)
    except Exception:  # pragma: no cover - conservative fallback
        cap = 64 * 1024 * 1024
    return min(cap * 3 // 4, 112 * 1024 * 1024)


@functools.partial(jax.jit, static_argnames=("k", "dilation", "tile_n"))
def dynconv_edge_forward(x, w, b, k=9, dilation=1, tile_n=None):
    """x: [N, C] float32 node features, w: [2C, CO], b: [CO].
       Returns [N, CO] float32 == DynConv(conv='edge', act='relu').forward(x)."""
    n, c = x.shape
    co = w.shape[1]
    if n <= k * dilation:
        raise ValueError("need more than k*dilation nodes for the kNN graph")

    if tile_n is None:
        # >=2 grid steps on small graphs (so "parallel" shards across both v7x
        # TensorCores); 256 on large graphs fills the 256-wide MXU on v6e/v7x.
        tile_n = 64 if n <= 256 else (256 if n >= 2048 else 128)

    pad_to = max(tile_n, 128)                     # lane-dense candidate axis
    n_pad = ((n + pad_to - 1) // pad_to) * pad_to

    xf = x.astype(jnp.float32)
    x_pad = jnp.pad(xf, ((0, n_pad - n), (0, 0)))             # (NP, C)
    x_t = x_pad.T                                             # (C, NP)
    sq = jnp.sum(x_pad * x_pad, axis=1)                       # (NP,)
    nsq_row = sq.reshape(1, n_pad)                            # (1, NP)
    qsq_col = sq.reshape(n_pad, 1)                            # (NP, 1)

    wf = w.astype(jnp.float32)
    w1, w2 = wf[:c], wf[c:]
    wd = w1 - w2                                              # x_i path weight
    b2 = b.reshape(1, co).astype(jnp.float32)

    kernel = functools.partial(_dyn_edgeconv_kernel,
                               n_valid=n, k=k, dilation=dilation)

    out = pl.pallas_call(
        kernel,
        out_shape=jax.ShapeDtypeStruct((n_pad, co), jnp.float32),
        grid_spec=pltpu.PrefetchScalarGridSpec(
            num_scalar_prefetch=0,
            grid=(n_pad // tile_n,),
            in_specs=[
                pl.BlockSpec((tile_n, c), lambda i: (i, 0)),    # query tile
                pl.BlockSpec((tile_n, 1), lambda i: (i, 0)),    # ||x_i||^2 tile
                pl.BlockSpec((n_pad, c), lambda i: (0, 0)),     # all nodes
                pl.BlockSpec((c, n_pad), lambda i: (0, 0)),     # all nodes, transposed
                pl.BlockSpec((1, n_pad), lambda i: (0, 0)),     # ||x_j||^2 row
                pl.BlockSpec((c, co), lambda i: (0, 0)),        # W1 - W2
                pl.BlockSpec((c, co), lambda i: (0, 0)),        # W2
                pl.BlockSpec((1, co), lambda i: (0, 0)),        # bias
            ],
            out_specs=pl.BlockSpec((tile_n, co), lambda i: (i, 0)),
        ),
        compiler_params=pltpu.CompilerParams(
            dimension_semantics=("parallel",),        # 2-TC sharding on v7x
            vmem_limit_bytes=_vmem_limit_bytes(),     # per-generation budget
        ),
    )(x_pad, qsq_col, x_pad, x_t, nsq_row, wd, w2, b2)

    return out[:n]


def reference_forward(x, w, b, k=9, dilation=1):
    """Pure-JAX reference: dilated kNN graph + EdgeConv(max) with Linear+ReLU."""
    hp = jax.lax.Precision.HIGHEST
    n = x.shape[0]
    sq = jnp.sum(x * x, axis=1)
    dist = sq[:, None] + sq[None, :] - 2.0 * jnp.dot(x, x.T, precision=hp)
    dist = jnp.where(jnp.eye(n, dtype=bool), jnp.inf, dist)
    _, idx = jax.lax.top_k(-dist, k * dilation)       # ascending distance
    idx = idx[:, ::dilation]                          # dilated subsample -> k nbrs
    x_j = x[idx]                                      # (N, k, C)
    x_i = jnp.broadcast_to(x[:, None, :], x_j.shape)
    msg = jnp.concatenate([x_i, x_j - x_i], axis=-1)  # (N, k, 2C)
    msg = jnp.dot(msg, w, precision=hp) + b
    msg = jax.nn.relu(msg)
    return jnp.max(msg, axis=1)


if __name__ == "__main__":
    N, C_IN, C_OUT, K, DIL = 100, 32, 128, 9, 1       # lane-dense 128-wide output

    key = jax.random.PRNGKey(0)
    kx, kw, kb = jax.random.split(key, 3)
    x = jax.random.normal(kx, (N, C_IN), dtype=jnp.float32)
    bound = (1.0 / (2 * C_IN)) ** 0.5                 # PyTorch Linear-style init
    w = jax.random.uniform(kw, (2 * C_IN, C_OUT),
                           minval=-bound, maxval=bound, dtype=jnp.float32)
    b = jax.random.uniform(kb, (C_OUT,),
                           minval=-bound, maxval=bound, dtype=jnp.float32)

    out = dynconv_edge_forward(x, w, b, k=K, dilation=DIL)
    out = jax.block_until_ready(out)

    ref = reference_forward(x, w, b, k=K, dilation=DIL)
    assert out.shape == (N, C_OUT)
    max_err = float(jnp.max(jnp.abs(out - ref)))
    assert jnp.allclose(out, ref, atol=1e-4, rtol=1e-4), f"mismatch: {max_err}"

    print("KERNEL_OK")
</pallas_src>

<mosaic_0001>
module attributes {stable_mosaic.version = 11 : i64} {
  func.func @_dyn_edgeconv_kernel(%arg0: i32, %arg1: memref<64x32xf32, #tpu.memory_space<vmem>>, %arg2: memref<64x1xf32, #tpu.memory_space<vmem>>, %arg3: memref<128x32xf32, #tpu.memory_space<vmem>>, %arg4: memref<32x128xf32, #tpu.memory_space<vmem>>, %arg5: memref<1x128xf32, #tpu.memory_space<vmem>>, %arg6: memref<32x128xf32, #tpu.memory_space<vmem>>, %arg7: memref<32x128xf32, #tpu.memory_space<vmem>>, %arg8: memref<1x128xf32, #tpu.memory_space<vmem>>, %arg9: memref<64x128xf32, #tpu.memory_space<vmem>>) attributes {dimension_semantics = [#tpu.dimension_semantics<parallel>], iteration_bounds = array<i64: 2>, scalar_prefetch = 0 : i64, scratch_operands = 0 : i64, tpu.core_type = #tpu.core_type<tc>, window_params = [{transform_indices = @transform_0, window_bounds = array<i64: 64, 32>}, {transform_indices = @transform_1, window_bounds = array<i64: 64, 1>}, {pipeline_mode = #tpu.pipeline_mode<synchronous>, transform_indices = @transform_2, window_bounds = array<i64: 128, 32>}, {pipeline_mode = #tpu.pipeline_mode<synchronous>, transform_indices = @transform_3, window_bounds = array<i64: 32, 128>}, {pipeline_mode = #tpu.pipeline_mode<synchronous>, transform_indices = @transform_4, window_bounds = array<i64: 1, 128>}, {pipeline_mode = #tpu.pipeline_mode<synchronous>, transform_indices = @transform_5, window_bounds = array<i64: 32, 128>}, {pipeline_mode = #tpu.pipeline_mode<synchronous>, transform_indices = @transform_6, window_bounds = array<i64: 32, 128>}, {pipeline_mode = #tpu.pipeline_mode<synchronous>, transform_indices = @transform_7, window_bounds = array<i64: 1, 128>}, {transform_indices = @transform_8, window_bounds = array<i64: 64, 128>}]} {
    %c0 = arith.constant 0 : index
    %c0_0 = arith.constant 0 : index
    %0 = vector.load %arg1[%c0, %c0_0] : memref<64x32xf32, #tpu.memory_space<vmem>>, vector<64x32xf32>
    %c0_1 = arith.constant 0 : index
    %c0_2 = arith.constant 0 : index
    %1 = vector.load %arg6[%c0_1, %c0_2] : memref<32x128xf32, #tpu.memory_space<vmem>>, vector<32x128xf32>
    %cst = arith.constant dense<0.000000e+00> : vector<64x128xf32>
    %2 = tpu.matmul %0, %1, %cst {dimension_numbers = #tpu.dot_dimension_numbers<[1], [0], [0], [1], [0, 0, 1, 1], [], []>} : vector<64x32xf32>, vector<32x128xf32>, vector<64x128xf32> -> vector<64x128xf32>
    %c0_3 = arith.constant 0 : index
    %c0_4 = arith.constant 0 : index
    %3 = vector.load %arg8[%c0_3, %c0_4] : memref<1x128xf32, #tpu.memory_space<vmem>>, vector<1x128xf32>
    %4 = vector.broadcast %3 : vector<1x128xf32> to vector<64x128xf32>
    %5 = arith.addf %2, %4 : vector<64x128xf32>
    %c0_5 = arith.constant 0 : index
    %c0_6 = arith.constant 0 : index
    %6 = vector.load %arg4[%c0_5, %c0_6] : memref<32x128xf32, #tpu.memory_space<vmem>>, vector<32x128xf32>
    %cst_7 = arith.constant dense<0.000000e+00> : vector<64x128xf32>
    %7 = tpu.matmul %0, %6, %cst_7 {dimension_numbers = #tpu.dot_dimension_numbers<[1], [0], [0], [1], [0, 0, 1, 1], [], []>} : vector<64x32xf32>, vector<32x128xf32>, vector<64x128xf32> -> vector<64x128xf32>
    %c0_8 = arith.constant 0 : index
    %c0_9 = arith.constant 0 : index
    %8 = vector.load %arg2[%c0_8, %c0_9] : memref<64x1xf32, #tpu.memory_space<vmem>>, vector<64x1xf32>
    %c0_10 = arith.constant 0 : index
    %c0_11 = arith.constant 0 : index
    %9 = vector.load %arg5[%c0_10, %c0_11] : memref<1x128xf32, #tpu.memory_space<vmem>>, vector<1x128xf32>
    %10 = vector.broadcast %8 : vector<64x1xf32> to vector<64x128xf32>
    %11 = vector.broadcast %9 : vector<1x128xf32> to vector<64x128xf32>
    %12 = arith.addf %10, %11 : vector<64x128xf32>
    %cst_12 = arith.constant 2.000000e+00 : f32
    %13 = vector.broadcast %cst_12 : f32 to vector<64x128xf32>
    %14 = arith.mulf %13, %7 : vector<64x128xf32>
    %15 = arith.subf %12, %14 : vector<64x128xf32>
    %c64_i32 = arith.constant 64 : i32
    %16 = arith.muli %arg0, %c64_i32 : i32
    %17 = tpu.iota {dimensions = array<i32: 0>} : vector<64x128xi32>
    %18 = vector.broadcast %16 : i32 to vector<64x128xi32>
    %19 = arith.addi %18, %17 : vector<64x128xi32>
    %20 = tpu.iota {dimensions = array<i32: 1>} : vector<64x128xi32>
    %21 = arith.cmpi eq, %20, %19 : vector<64x128xi32>
    %c100_i32 = arith.constant 100 : i32
    %22 = vector.broadcast %c100_i32 : i32 to vector<64x128xi32>
    %23 = arith.cmpi sge, %20, %22 : vector<64x128xi32>
    %24 = arith.ori %21, %23 : vector<64x128xi1>
    %cst_13 = arith.constant 0x7F800000 : f32
    %25 = vector.broadcast %cst_13 : f32 to vector<64x128xf32>
    %26 = arith.select %24, %25, %15 : vector<64x128xi1>, vector<64x128xf32>
    %c0_14 = arith.constant 0 : index
    %c0_15 = arith.constant 0 : index
    %27 = vector.load %arg3[%c0_14, %c0_15] : memref<128x32xf32, #tpu.memory_space<vmem>>, vector<128x32xf32>
    %c0_16 = arith.constant 0 : index
    %c0_17 = arith.constant 0 : index
    %28 = vector.load %arg7[%c0_16, %c0_17] : memref<32x128xf32, #tpu.memory_space<vmem>>, vector<32x128xf32>
    %cst_18 = arith.constant 0xFF800000 : f32
    %29 = vector.broadcast %cst_18 : f32 to vector<64x128xf32>
    %c0_i32 = arith.constant 0 : i32
    %c9_i32 = arith.constant 9 : i32
    %30 = arith.addi %c0_i32, %c9_i32 : i32
    %c1_i32 = arith.constant 1 : i32
    %31:2 = scf.for %arg10 = %c0_i32 to %30 step %c1_i32 iter_args(%arg11 = %26, %arg12 = %29) -> (vector<64x128xf32>, vector<64x128xf32>)  : i32 {
      %cst_22 = arith.constant dense<0x7F800000> : vector<64xf32>
      %36 = vector.multi_reduction <minimumf>, %arg11, %cst_22 [1] : vector<64x128xf32> to vector<64xf32>
      %37 = vector.shape_cast %36 : vector<64xf32> to vector<64x1xf32>
      %38 = vector.broadcast %37 : vector<64x1xf32> to vector<64x128xf32>
      %39 = arith.cmpf oeq, %arg11, %38 : vector<64x128xf32>
      %c128_i32 = arith.constant 128 : i32
      %40 = vector.broadcast %c128_i32 : i32 to vector<64x128xi32>
      %41 = arith.select %39, %20, %40 : vector<64x128xi1>, vector<64x128xi32>
      %cst_23 = arith.constant dense<2147483647> : vector<64xi32>
      %42 = vector.multi_reduction <minsi>, %41, %cst_23 [1] : vector<64x128xi32> to vector<64xi32>
      %43 = vector.shape_cast %42 : vector<64xi32> to vector<64x1xi32>
      %44 = vector.broadcast %43 : vector<64x1xi32> to vector<64x128xi32>
      %45 = arith.cmpi eq, %20, %44 : vector<64x128xi32>
      %cst_24 = arith.constant 0x7F800000 : f32
      %46 = vector.broadcast %cst_24 : f32 to vector<64x128xf32>
      %47 = arith.select %45, %46, %arg11 : vector<64x128xi1>, vector<64x128xf32>
      %48 = arith.extui %45 : vector<64x128xi1> to vector<64x128xi32>
      %49 = arith.sitofp %48 : vector<64x128xi32> to vector<64x128xf32>
      %cst_25 = arith.constant dense<0.000000e+00> : vector<64x32xf32>
      %50 = tpu.matmul %49, %27, %cst_25 {dimension_numbers = #tpu.dot_dimension_numbers<[1], [0], [0], [1], [0, 0, 1, 1], [], []>} : vector<64x128xf32>, vector<128x32xf32>, vector<64x32xf32> -> vector<64x32xf32>
      %cst_26 = arith.constant dense<0.000000e+00> : vector<64x128xf32>
      %51 = tpu.matmul %50, %28, %cst_26 {dimension_numbers = #tpu.dot_dimension_numbers<[1], [0], [0], [1], [0, 0, 1, 1], [], []>} : vector<64x32xf32>, vector<32x128xf32>, vector<64x128xf32> -> vector<64x128xf32>
      %52 = arith.maximumf %arg12, %51 : vector<64x128xf32>
      scf.yield %47, %52 : vector<64x128xf32>, vector<64x128xf32>
    }
    %32 = arith.addf %5, %31#1 : vector<64x128xf32>
    %cst_19 = arith.constant 0.000000e+00 : f32
    %33 = vector.broadcast %cst_19 : f32 to vector<64x128xf32>
    %34 = arith.maximumf %32, %33 : vector<64x128xf32>
    %c0_20 = arith.constant 0 : index
    %c0_21 = arith.constant 0 : index
    %35 = vector.load %arg9[%c0_20, %c0_21] : memref<64x128xf32, #tpu.memory_space<vmem>>, vector<64x128xf32>
    tpu.vector_store %arg9[%c0_20, %c0_21], %34 {strides = array<i32>} : memref<64x128xf32, #tpu.memory_space<vmem>>, vector<64x128xf32>,
    return
  }
  func.func @transform_0(%arg0: i32) -> (i32, i32) {
    %c0_i32 = arith.constant 0 : i32
    %c0_i32_0 = arith.constant 0 : i32
    return %arg0, %c0_i32 : i32, i32
  }
  func.func @transform_1(%arg0: i32) -> (i32, i32) {
    %c0_i32 = arith.constant 0 : i32
    %c0_i32_0 = arith.constant 0 : i32
    return %arg0, %c0_i32 : i32, i32
  }
  func.func @transform_2(%arg0: i32) -> (i32, i32) {
    %c0_i32 = arith.constant 0 : i32
    %c0_i32_0 = arith.constant 0 : i32
    %c0_i32_1 = arith.constant 0 : i32
    return %c0_i32, %c0_i32_0 : i32, i32
  }
  func.func @transform_3(%arg0: i32) -> (i32, i32) {
    %c0_i32 = arith.constant 0 : i32
    %c0_i32_0 = arith.constant 0 : i32
    %c0_i32_1 = arith.constant 0 : i32
    return %c0_i32, %c0_i32_0 : i32, i32
  }
  func.func @transform_4(%arg0: i32) -> (i32, i32) {
    %c0_i32 = arith.constant 0 : i32
    %c0_i32_0 = arith.constant 0 : i32
    %c0_i32_1 = arith.constant 0 : i32
    return %c0_i32, %c0_i32_0 : i32, i32
  }
  func.func @transform_5(%arg0: i32) -> (i32, i32) {
    %c0_i32 = arith.constant 0 : i32
    %c0_i32_0 = arith.constant 0 : i32
    %c0_i32_1 = arith.constant 0 : i32
    return %c0_i32, %c0_i32_0 : i32, i32
  }
  func.func @transform_6(%arg0: i32) -> (i32, i32) {
    %c0_i32 = arith.constant 0 : i32
    %c0_i32_0 = arith.constant 0 : i32
    %c0_i32_1 = arith.constant 0 : i32
    return %c0_i32, %c0_i32_0 : i32, i32
  }
  func.func @transform_7(%arg0: i32) -> (i32, i32) {
    %c0_i32 = arith.constant 0 : i32
    %c0_i32_0 = arith.constant 0 : i32
    %c0_i32_1 = arith.constant 0 : i32
    return %c0_i32, %c0_i32_0 : i32, i32
  }
  func.func @transform_8(%arg0: i32) -> (i32, i32) {
    %c0_i32 = arith.constant 0 : i32
    %c0_i32_0 = arith.constant 0 : i32
    return %arg0, %c0_i32 : i32, i32
  }
}

</mosaic_0001>

<bundles_post_ra>
// kernel: dynconv_edge_forward.1
= control target key start
LH: loop header
LB: loop body
LE: loop exit
PB: predicated region body
PF: predicated region fallthrough
CT: control target
= control target key end

     0   :  { %s1497_s27 = smov 0   ;;  %s2070_s0 = inlined_call_operand.vmem [shape: f32[128,32], index: 0, kind: input, shape index: {}, may-alias: {0,2}]   ;;  %s2071_s1 = inlined_call_operand.vmem [shape: f32[128,1], index: 1, kind: input, shape index: {}]   ;;  %s2072_s2 = inlined_call_operand.vmem [shape: f32[128,32], index: 2, kind: input, shape index: {}, may-alias: {0,2}]   ;;  %s2073_s3 = inlined_call_operand.vmem [shape: f32[32,128], index: 3, kind: input, shape index: {}]   ;;  %s2074_s4 = inlined_call_operand.vmem [shape: f32[1,128], index: 4, kind: input, shape index: {}]   ;;  %s2075_s5 = inlined_call_operand.vmem [shape: f32[32,128], index: 5, kind: input, shape index: {}]   ;;  %s2076_s6 = inlined_call_operand.vmem [shape: f32[32,128], index: 6, kind: input, shape index: {}]   ;;  %s2077_s7 = inlined_call_operand.vmem [shape: f32[1,128], index: 7, kind: input, shape index: {}]   ;;  %s2078_s8 = inlined_call_operand.vmem [shape: f32[128,128], index: 8, kind: output, shape index: {}]  }
   0x1 LB: > { %s1057_s28 = sadd.s32 4294967295, %s1380_s27   ;;  %p1061_p0 = scmp.ge.s32.totalorder %s1380_s27, 1  ;;  %s1380_s27 = sphi %s1497_s27, %s18_s27  }
   0x2   : > { %p274_p1 = scmp.lt.s32.totalorder %s1380_s27, 3 }
   0x4   : > { %p275_p2 = pnand %p1061_p0, %p274_p1 }
   0x6   : > { %278 = sbr.rel (%p275_p2) target bundleno = 851 (0x353), region = 52 }
   0xb   : > { %v416_v0 = vld [vmem:[%s2073_s3 + $0x18] sm:$0xff]  ;;  %v415_v1 = vld [vmem:[%s2073_s3 + $0x10] sm:$0xff]  ;;  %s1062_s13 = sshll.u32 %s1057_s28, 3  ;;  %v414_v4 = vld [vmem:[%s2073_s3 + $0x8] sm:$0xff]  ;;  %vm347_vm0 = vcmask 261120   ;;  %v1450_v11 = vmov 0   ;;  %v535_v25 = vlaneseq }
   0xc   : > { %v342_v2 = vld [vmem:[%s2075_s5 + $0x18] sm:$0xff]  ;;  %429 = vmatpush.msra.mxu1 %v416_v0  ;;  %1115 = vmatpush.msra.mxu3 %v416_v0  ;;  %v341_v3 = vld [vmem:[%s2075_s5 + $0x10] sm:$0xff]  ;;  %p314_p3 = scmp.lt.s32.totalorder %s1062_s13, 15  ;;  %v340_v5 = vld [vmem:[%s2075_s5 + $0x8] sm:$0xff]  ;;  %s1084_s14 = sshll.u32 %s1057_s28, 6 }
   0xd   : > { %1111 = vmatpush.msra.mxu2 %v342_v2  ;;  %384 = vmatpush.msra.mxu0 %v342_v2  ;;  %v413_v6 = vld [vmem:[%s2073_s3] sm:$0xff]  ;;  %v1578_v26 = vshrl.u32 %v535_v25, 7  ;;  %v1582_v27 = vstv %s1084_s14  ;;  %v1587_v30 = vand.u32 127, %v535_v25  ;;  %v1622_v44 = vld [vmem:[%s2072_s2 + $0x8] sm:$0xff]  ;;  %v1627_v45 = vld [vmem:[%s2072_s2 + $0x10] sm:$0xff]  ;;  %s1818_s18 = smov 0  }
   0xe   : > { %430 = vmatpush.msra.mxu1 %v415_v1  ;;  %1116 = vmatpush.msra.mxu3 %v415_v1  ;;  %s2130_s13 = smov (!%p314_p3, %s1062_s13), 15  ;;  %v339_v7 = vld [vmem:[%s2075_s5] sm:$0xff]  ;;  %2095 = vst [vmem:[#allocation3_spill] sm:$0xff] %v1622_v44  ;;  %v1632_v47 = vld [vmem:[%s2072_s2 + $0x18] sm:$0xff]  ;;  %v1642_v49 = vld [vmem:[%s2072_s2 + $0x28] sm:$0xff] }
   0xf   : > { %1112 = vmatpush.msra.mxu2 %v341_v3  ;;  %385 = vmatpush.msra.mxu0 %v341_v3  ;;  %s1063_s22 = sshll.u32 %s2130_s13, 3  ;;  %v540_v28 = vadd.s32 32, %v1578_v26  ;;  %v545_v29 = vadd.s32 %v1582_v27, %v1578_v26  ;;  %v1592_v31 = vld [vmem:[%s2074_s4] ss:$0 sm:$0xff]  ;;  %vm563_vm2 = vcmp.ge.s32.totalorder %v1587_v30, 100  ;;  %v537_v35 = vadd.s32 8, %v1578_v26 }
  0x10   : > { %431 = vmatpush.msra.mxu1 %v414_v4  ;;  %1117 = vmatpush.msra.mxu3 %v414_v4  ;;  %s1531_s25 = scalar_lea.vmem %s2070_s0, %s1063_s22  ;;  %s1536_s30 = scalar_lea.vmem %s2078_s8, %s1063_s22  ;;  %v1605_v39 = vld [vmem:[%s2077_s7] ss:$0 sm:$0xff]  ;;  %2096 = vst [vmem:[#allocation4_spill] sm:$0xff] %v1627_v45  ;;  %v541_v53 = vadd.s32 40, %v1578_v26  ;;  %v1654_v54 = vld [vmem:[%s2072_s2 + $0x30] sm:$0xff]  ;;  %v1659_v55 = vld [vmem:[%s2072_s2 + $0x38] sm:$0xff] }
  0x11   : > { %1113 = vmatpush.msra.mxu2 %v340_v5  ;;  %386 = vmatpush.msra.mxu0 %v340_v5  ;;  %v331_v8 = vld [vmem:[%s1531_s25] sm:$0xff]  ;;  %s1546_s13 = scalar_lea.vmem %s2071_s1, %s1063_s22  ;;  %v332_v14 = vld [vmem:[%s1531_s25 + $0x8] sm:$0xff]  ;;  %v333_v19 = vld [vmem:[%s1531_s25 + $0x10] sm:$0xff]  ;;  %v549_v32 = vadd.s32 %v1582_v27, %v540_v28  ;;  %vm555_vm1 = vcmp.eq.s32.totalorder %v1587_v30, %v545_v29  ;;  %v546_v42 = vadd.s32 %v1582_v27, %v537_v35  ;;  %v538_v1 = vadd.s32 16, %v1578_v26 }
  0x12   : > { %432 = vmatpush.msra.mxu1 %v413_v6  ;;  %1118 = vmatpush.msra.mxu3 %v413_v6  ;;  %v335_v9 = vld [vmem:[%s1531_s25 + $0x20] sm:$0xff]  ;;  %v460_v10 = vld [vmem:[%s1546_s13 + $0x10] sm:$0xff]  ;;  %v336_v15 = vld [vmem:[%s1531_s25 + $0x28] sm:$0xff]  ;;  %2097 = vst [vmem:[#allocation5_spill] sm:$0xff] %v1632_v47  ;;  %v539_v29 = vadd.s32 24, %v1578_v26 }
  0x13   : > { %1076 = vmatmul.msk.f32.vlgmr.msra.gmra.mxu1 %vm347_vm0, %v331_v8  ;;  %1080 = vmatmul.msk.f32.vlgmr.msra.gmra.mxu3 %vm347_vm0, %v335_v9  ;;  %v458_v12 = vld [vmem:[%s1546_s13] sm:$0xff]  ;;  %v461_v16 = vld [vmem:[%s1546_s13 + $0x18] sm:$0xff]  ;;  %v459_v17 = vld [vmem:[%s1546_s13 + $0x8] sm:$0xff]  ;;  %vm559_vm3 = vcmp.eq.s32.totalorder %v1587_v30, %v549_v32  ;;  %vm556_vm6 = vcmp.eq.s32.totalorder %v1587_v30, %v546_v42 }
  0x14   : > { %1114 = vmatpush.msra.mxu2 %v339_v7  ;;  %1302 = vset.pattern.permute.xlu1 %v1450_v11  ;;  %v462_v13 = vld [vmem:[%s1546_s13 + $0x20] sm:$0xff]  ;;  %v463_v18 = vld [vmem:[%s1546_s13 + $0x28] sm:$0xff]  ;;  %v337_v20 = vld [vmem:[%s1531_s25 + $0x30] sm:$0xff] }
  0x15   : > { %1072 = vmatmul.msk.f32.vlgmr.msra.gmra.mxu2 %vm347_vm0, %v335_v9  ;;  %1301 = vset.pattern.permute.xlu0 %v1450_v11  ;;  %v465_v21 = vld [vmem:[%s1546_s13 + $0x38] sm:$0xff]  ;;  %v464_v22 = vld [vmem:[%s1546_s13 + $0x30] sm:$0xff]  ;;  %vm564_vm4 = vmor %vm555_vm1, %vm563_vm2 }
  0x16   : > { %387 = vmatpush.msra.mxu0 %v339_v7  ;;  %479 = vperm.xlu1 %1302, %v460_v10   ;;  %v334_v23 = vld [vmem:[%s1531_s25 + $0x18] sm:$0xff]  ;;  %vm1609_vm5 = vmor %vm559_vm3, %vm563_vm2  ;;  %v1617_v43 = vld [vmem:[%s2072_s2] sm:$0xff] }
  0x17   : > { %469 = vperm.xlu0 %1301, %v458_v12   ;;  %1068 = vmatmul.msk.f32.vlgmr.msra.gmra.mxu0 %vm347_vm0, %v331_v8  ;;  %v338_v24 = vld [vmem:[%s1531_s25 + $0x38] sm:$0xff]  ;;  %2094 = vst [vmem:[#allocation2_spill] sm:$0xff] %v1617_v43  ;;  %v1637_v48 = vld [vmem:[%s2072_s2 + $0x20] sm:$0xff]  ;;  %v1669_v59 = vld [vmem:[%s2072_s2 + $0x48] sm:$0xff] }
  0x18   : > { %1303 = vset.pattern.permute.xlu2 %v1450_v11  ;;  %2098 = vst [vmem:[#allocation6_spill] sm:$0xff] %v1637_v48  ;;  %v1664_v56 = vld [vmem:[%s2072_s2 + $0x40] sm:$0xff]  ;;  %v1674_v60 = vld [vmem:[%s2072_s2 + $0x50] sm:$0xff]  ;;  %v1679_v61 = vld [vmem:[%s2072_s2 + $0x58] sm:$0xff] }
  0x19   : > { %489 = vperm.xlu2 %1303, %v462_v13   ;;  %v1687_v2 = vld [vmem:[%s2072_s2 + $0x60] sm:$0xff]  ;;  %v1692_v3 = vld [vmem:[%s2072_s2 + $0x68] sm:$0xff]  ;;  %v1697_v4 = vld [vmem:[%s2072_s2 + $0x70] sm:$0xff]  ;;  %v550_v13 = vadd.s32 %v1582_v27, %v541_v53 }
  0x1a   : > { %2099 = vst [vmem:[#allocation7_spill] sm:$0xff] %v1687_v2  ;;  %v1702_v7 = vld [vmem:[%s2072_s2 + $0x78] sm:$0xff]  ;;  %v1707_v8 = vld [vmem:[%s2076_s6] sm:$0xff]  ;;  %v1712_v9 = vld [vmem:[%s2076_s6 + $0x8] sm:$0xff] }
  0x1b   : > { %1077 = vmatmul.msk.f32.gmra.mxu1 %vm347_vm0, %v332_v14  ;;  %1081 = vmatmul.msk.f32.gmra.mxu3 %vm347_vm0, %v336_v15  ;;  %2100 = vst [vmem:[#allocation8_spill] sm:$0xff] %v1692_v3  ;;  %vm565_vm7 = vmor %vm556_vm6, %vm563_vm2  ;;  %vm560_vm8 = vcmp.eq.s32.totalorder %v1587_v30, %v550_v13 }
  0x1c   : > { %2101 = vst [vmem:[#allocation9_spill] sm:$0xff] %v1697_v4  ;;  %vm569_vm10 = vmor %vm560_vm8, %vm563_vm2 }
  0x1d   : > { %1073 = vmatmul.msk.f32.gmra.mxu2 %vm347_vm0, %v336_v15  ;;  %2102 = vst [vmem:[#allocation10_spill] sm:$0xff] %v1702_v7  ;;  %v1726_v15 = vld [vmem:[%s2076_s6 + $0x18] sm:$0xff] }
  0x1e   : > { %484 = vperm.xlu1 %1302, %v461_v16   ;;  %2103 = vst [vmem:[#allocation11_spill] sm:$0xff] %v1707_v8 }
  0x1f   : > { %474 = vperm.xlu0 %1301, %v459_v17   ;;  %1069 = vmatmul.msk.f32.gmra.mxu0 %vm347_vm0, %v332_v14  ;;  %2104 = vst [vmem:[#allocation12_spill] sm:$0xff] %v1712_v9  ;;  %v1721_v14 = vld [vmem:[%s2076_s6 + $0x10] sm:$0xff] }
  0x20   : > { %2105 = vst [vmem:[#allocation13_spill] sm:$0xff] %v1721_v14 }
  0x21   : > { %494 = vperm.xlu2 %1303, %v463_v18   ;;  %2106 = vst [vmem:[#allocation14_spill] sm:$0xff] %v1726_v15 }
  0x23   : > { %1078 = vmatmul.msk.f32.gmra.mxu1 %vm347_vm0, %v333_v19  ;;  %1082 = vmatmul.msk.f32.gmra.mxu3 %vm347_vm0, %v337_v20 }
  0x25   : > { %1074 = vmatmul.msk.f32.gmra.mxu2 %vm347_vm0, %v337_v20 }
  0x26   : > { %504 = vperm.xlu1 %1302, %v465_v21   ;;  %v542_v21 = vadd.s32 48, %v1578_v26 }
  0x27   : > { %499 = vperm.xlu0 %1301, %v464_v22   ;;  %1070 = vmatmul.msk.f32.gmra.mxu0 %vm347_vm0, %v333_v19  ;;  %v547_v19 = vadd.s32 %v1582_v27, %v538_v1 }
  0x29   : > { %vm557_vm9 = vcmp.eq.s32.totalorder %v1587_v30, %v547_v19 }
  0x2a   : > { %vm566_vm11 = vmor %vm557_vm9, %vm563_vm2 }
  0x2b   : > { %1079 = vmatmul.msk.f32.gmra.mxu1 %vm347_vm0, %v334_v23  ;;  %1083 = vmatmul.msk.f32.gmra.mxu3 %vm347_vm0, %v338_v24 }
  0x2d   : > { %1075 = vmatmul.msk.f32.gmra.mxu2 %vm347_vm0, %v338_v24 }
  0x2f   : > { %1071 = vmatmul.msk.f32.gmra.mxu0 %vm347_vm0, %v334_v23 }
  0x73   : > { %v490_v37 = vpop.permute.xlu2 %489 }
  0x74   : > { %v514_v51 = vadd.f32 %v1592_v31, %v490_v37 }
  0x7b   : > { %v495_v16 = vpop.permute.xlu2 %494 }
  0x7c   : > { %v515_v23 = vadd.f32 %v1592_v31, %v495_v16 }
  0x88   : > { %v480_v62 = vpop.permute.xlu1 %479 }
  0x89   : > { %v470_v33 = vpop.permute.xlu0 %469  ;;  %v512_v35 = vadd.f32 %v1592_v31, %v480_v62 }
  0x8a   : > { %v510_v34 = vadd.f32 %v1592_v31, %v470_v33 }
  0x90   : > { %v434_v36 = vpop.f32.mrf.mxu1  ;;  %v485_v40 = vpop.permute.xlu1 %484 }
  0x91   : > { %v518_v38 = vmul.f32 2.0, %v434_v36  ;;  %v475_v57 = vpop.permute.xlu0 %474 }
  0x92   : > { %v511_v63 = vadd.f32 %v1592_v31, %v475_v57  ;;  %v543_v57 = vadd.s32 56, %v1578_v26  ;;  %v513_v26 = vadd.f32 %v1592_v31, %v485_v40  ;;  %v1787_v40 = vmov -inf  }
  0x93   : > { %v526_v41 = vsub.f32 %v510_v34, %v518_v38  ;;  %v551_v34 = vadd.s32 %v1582_v27, %v542_v21 }
  0x94   : > { %v389_v46 = vpop.f32.mrf.mxu0 }
  0x95   : > { %v1644_v50 = vsel %vm564_vm4, inf, %v526_v41   ;;  %v1648_v52 = vadd.f32 %v1605_v39, %v389_v46  ;;  %v548_v46 = vadd.s32 %v1582_v27, %v539_v29  ;;  %vm561_vm12 = vcmp.eq.s32.totalorder %v1587_v30, %v551_v34 }
  0x96   : > { %v446_v58 = vpop.f32.mrf.mxu3  ;;  %vm570_vm14 = vmor %vm561_vm12, %vm563_vm2 }
  0x97   : > { %v522_v0 = vmul.f32 2.0, %v446_v58  ;;  %vm558_vm13 = vcmp.eq.s32.totalorder %v1587_v30, %v548_v46  ;;  %v1791_v46 = vmov -inf  }
  0x98   : > { %v437_v5 = vpop.f32.mrf.mxu1  ;;  %v401_v6 = vpop.f32.mrf.mxu2  ;;  %vm567_vm15 = vmor %vm558_vm13, %vm563_vm2 }
  0x99   : > { %v530_v10 = vsub.f32 %v514_v51, %v522_v0  ;;  %v519_v11 = vmul.f32 2.0, %v437_v5  ;;  %v1715_v12 = vadd.f32 %v1605_v39, %v401_v6  ;;  %v500_v51 = vpop.permute.xlu0 %499 }
  0x9a   : > { %v516_v0 = vadd.f32 %v1592_v31, %v500_v51  ;;  %v1795_v51 = vmov -inf  }
  0x9b   : > { %v1734_v17 = vsel %vm1609_vm5, inf, %v530_v10   ;;  %v527_v18 = vsub.f32 %v511_v63, %v519_v11  ;;  %v552_v10 = vadd.s32 %v1582_v27, %v543_v57 }
  0x9c   : > { %v392_v20 = vpop.f32.mrf.mxu0 }
  0x9d   : > { %v1738_v22 = vsel %vm565_vm7, inf, %v527_v18   ;;  %v1743_v24 = vadd.f32 %v1605_v39, %v392_v20  ;;  %v505_v20 = vpop.permute.xlu1 %504  ;;  %vm562_vm1 = vcmp.eq.s32.totalorder %v1587_v30, %v552_v10 }
  0x9e   : > { %v449_v25 = vpop.f32.mrf.mxu3  ;;  %vm571_vm3 = vmor %vm562_vm1, %vm563_vm2 }
  0x9f   : > { %v523_v28 = vmul.f32 2.0, %v449_v25 }
  0xa0   : > { %v440_v32 = vpop.f32.mrf.mxu1  ;;  %v404_v33 = vpop.f32.mrf.mxu2 }
  0xa1   : > { %v531_v36 = vsub.f32 %v515_v23, %v523_v28  ;;  %v520_v37 = vmul.f32 2.0, %v440_v32  ;;  %v1752_v38 = vadd.f32 %v1605_v39, %v404_v33  ;;  %v517_v28 = vadd.f32 %v1592_v31, %v505_v20 }
  0xa2   : > { %v1793_v31 = vmov -inf  }
  0xa3   : > { %v577_v41 = vsel %vm569_vm10, inf, %v531_v36   ;;  %v528_v42 = vsub.f32 %v512_v35, %v520_v37  ;;  %v1783_v36 = vmov -inf   ;;  %v1785_v37 = vmov -inf  }
  0xa4   : > { %v395_v53 = vpop.f32.mrf.mxu0 }
  0xa5   : > { %v574_v58 = vsel %vm566_vm11, inf, %v528_v42   ;;  %v1760_v62 = vadd.f32 %v1605_v39, %v395_v53  ;;  %v1789_v42 = vmov -inf   ;;  %v1797_v53 = vmov -inf  }
  0xa6   : > { %v452_v63 = vpop.f32.mrf.mxu3 }
  0xa7   : > { %v524_v1 = vmul.f32 2.0, %v452_v63 }
  0xa8   : > { %v443_v5 = vpop.f32.mrf.mxu1  ;;  %v407_v6 = vpop.f32.mrf.mxu2 }
  0xa9   : > { %v532_v11 = vsub.f32 %v516_v0, %v524_v1  ;;  %v521_v13 = vmul.f32 2.0, %v443_v5  ;;  %v1769_v16 = vadd.f32 %v1605_v39, %v407_v6 }
  0xab   : > { %v578_v18 = vsel %vm570_vm14, inf, %v532_v11   ;;  %v529_v19 = vsub.f32 %v513_v26, %v521_v13 }
  0xac   : > { %v398_v21 = vpop.f32.mrf.mxu0 }
  0xad   : > { %v575_v23 = vsel %vm567_vm15, inf, %v529_v19   ;;  %v1775_v25 = vadd.f32 %v1605_v39, %v398_v21 }
  0xae   : > { %v455_v27 = vpop.f32.mrf.mxu3 }
  0xaf   : > { %v525_v29 = vmul.f32 2.0, %v455_v27 }
  0xb0   : > { %v410_v32 = vpop.f32.mrf.mxu2 }
  0xb1   : > { %v533_v33 = vsub.f32 %v517_v28, %v525_v29  ;;  %v1781_v34 = vadd.f32 %v1605_v39, %v410_v32 }
  0xb3   : > { %v579_v35 = vsel %vm571_vm3, inf, %v533_v33  }
  0xb4 LB: >> { %v2107_v48 = vld [vmem:[#allocation6_spill] sm:$0xff]  ;;  %v2108_v47 = vld [vmem:[#allocation5_spill] sm:$0xff]  ;;  %v2109_v45 = vld [vmem:[#allocation4_spill] sm:$0xff]  ;;  %628 = vmin.xlane.f32.xlu0 %v1432_v23  ;;  %630 = vmin.xlane.f32.xlu1 %v1428_v17  ;;  %s605_s18 = sadd.s32 1, %s1448_s18   ;;  %v1432_v23 = vphi %v575_v23, %v1954_v23   ;;  %v1428_v17 = vphi %v1734_v17, %v1959_v17   ;;  %v1424_v41 = vphi %v577_v41, %v779_v41   ;;  %v1420_v18 = vphi %v578_v18, %v780_v18   ;;  %v1416_v35 = vphi %v579_v35, %v781_v35   ;;  %v1412_v53 = vphi %v1797_v53, %v2128_v53   ;;  %v1408_v51 = vphi %v1795_v51, %v2127_v51   ;;  %v1404_v31 = vphi %v1793_v31, %v2126_v31   ;;  %v1400_v46 = vphi %v1791_v46, %v2125_v46   ;;  %v1396_v42 = vphi %v1789_v42, %v2124_v42   ;;  %v1392_v40 = vphi %v1787_v40, %v2123_v40   ;;  %v1388_v37 = vphi %v1785_v37, %v2122_v37   ;;  %v1384_v36 = vphi %v1783_v36, %v2121_v36   ;;  %s1448_s18 = sphi %s1818_s18, %s605_s18   ;;  %v1444_v50 = vphi %v1644_v50, %v1964_v50   ;;  %v1440_v22 = vphi %v1738_v22, %v1971_v22   ;;  %v1436_v58 = vphi %v574_v58, %v1977_v58  }
  0xb5   : >> { %v2110_v44 = vld [vmem:[#allocation3_spill] sm:$0xff]  ;;  %v2111_v43 = vld [vmem:[#allocation2_spill] sm:$0xff]  ;;  %v2113_v14 = vld [vmem:[#allocation13_spill] sm:$0xff]  ;;  %632 = vmin.xlane.f32.xlu2 %v1424_v41  ;;  %p2006_p4 = scmp.ge.s32.totalorder %s605_s18, 9  }
  0xb6   : >> { %v2112_v15 = vld [vmem:[#allocation14_spill] sm:$0xff]  ;;  %v2114_v9 = vld [vmem:[#allocation12_spill] sm:$0xff]  ;;  %v2115_v8 = vld [vmem:[#allocation11_spill] sm:$0xff] }
  0xb7   : >> { %v2116_v7 = vld [vmem:[#allocation10_spill] sm:$0xff]  ;;  %v2117_v4 = vld [vmem:[#allocation9_spill] sm:$0xff]  ;;  %v2118_v3 = vld [vmem:[#allocation8_spill] sm:$0xff]  ;;  %875 = vmatpush.msra.mxu1 %v2112_v15 }
  0xb8   : >> { %v2119_v2 = vld [vmem:[#allocation7_spill] sm:$0xff]  ;;  %1119 = vmatpush.msra.mxu2 %v2116_v7  ;;  %798 = vmatpush.msra.mxu0 %v2116_v7 }
  0xb9   : >> { %1120 = vmatpush.msra.mxu3 %v2116_v7  ;;  %876 = vmatpush.msra.mxu1 %v2113_v14 }
  0xba   : >> { %1121 = vmatpush.msra.mxu2 %v2117_v4  ;;  %799 = vmatpush.msra.mxu0 %v2117_v4 }
  0xbb   : >> { %1122 = vmatpush.msra.mxu3 %v2117_v4  ;;  %877 = vmatpush.msra.mxu1 %v2114_v9 }
  0xbc   : >> { %1123 = vmatpush.msra.mxu2 %v2118_v3  ;;  %800 = vmatpush.msra.mxu0 %v2118_v3 }
  0xbd   : >> { %1124 = vmatpush.msra.mxu3 %v2118_v3  ;;  %878 = vmatpush.msra.mxu1 %v2115_v8 }
  0xbe   : >> { %1125 = vmatpush.msra.mxu2 %v2119_v2  ;;  %801 = vmatpush.msra.mxu0 %v2119_v2 }
  0xbf   : >> { %1126 = vmatpush.msra.mxu3 %v2119_v2  ;;  %622 = vmin.xlane.f32.xlu0 %v1444_v50 }
  0xc0   : >> { %1127 = vmatpush.msra.mxu2 %v1679_v61  ;;  %624 = vmin.xlane.f32.xlu1 %v1440_v22 }
  0xc1   : >> { %626 = vmin.xlane.f32.xlu2 %v1436_v58  ;;  %802 = vmatpush.msra.mxu0 %v1679_v61 }
  0xc2   : >> { %1129 = vmatpush.msra.mxu2 %v1674_v60  ;;  %1128 = vmatpush.msra.mxu3 %v1679_v61 }
  0xc3   : >> { %803 = vmatpush.msra.mxu0 %v1674_v60 }
  0xc4   : >> { %1131 = vmatpush.msra.mxu2 %v1669_v59  ;;  %1130 = vmatpush.msra.mxu3 %v1674_v60 }
  0xc5   : >> { %804 = vmatpush.msra.mxu0 %v1669_v59 }
  0xc6   : >> { %1133 = vmatpush.msra.mxu2 %v1664_v56  ;;  %1132 = vmatpush.msra.mxu3 %v1669_v59 }
  0xc7   : >> { %634 = vmin.xlane.f32.xlu0 %v1420_v18  ;;  %805 = vmatpush.msra.mxu0 %v1664_v56 }
  0xc8   : >> { %1135 = vmatpush.msra.mxu2 %v1659_v55  ;;  %636 = vmin.xlane.f32.xlu1 %v1416_v35 }
  0xc9   : >> { %1134 = vmatpush.msra.mxu3 %v1664_v56  ;;  %806 = vmatpush.msra.mxu0 %v1659_v55 }
  0xca   : >> { %1137 = vmatpush.msra.mxu2 %v1654_v54 }
  0xcb   : >> { %1136 = vmatpush.msra.mxu3 %v1659_v55  ;;  %807 = vmatpush.msra.mxu0 %v1654_v54 }
  0xcc   : >> { %1139 = vmatpush.msra.mxu2 %v1642_v49 }
  0xcd   : >> { %1138 = vmatpush.msra.mxu3 %v1654_v54  ;;  %808 = vmatpush.msra.mxu0 %v1642_v49 }
  0xce   : >> { %1141 = vmatpush.msra.mxu2 %v2107_v48 }
  0xcf   : >> { %1140 = vmatpush.msra.mxu3 %v1642_v49  ;;  %809 = vmatpush.msra.mxu0 %v2107_v48 }
  0xd0   : >> { %1143 = vmatpush.msra.mxu2 %v2108_v47 }
  0xd1   : >> { %1142 = vmatpush.msra.mxu3 %v2107_v48  ;;  %810 = vmatpush.msra.mxu0 %v2108_v47 }
  0xd2   : >> { %1145 = vmatpush.msra.mxu2 %v2109_v45 }
  0xd3   : >> { %1144 = vmatpush.msra.mxu3 %v2108_v47  ;;  %811 = vmatpush.msra.mxu0 %v2109_v45 }
  0xd4   : >> { %1147 = vmatpush.msra.mxu2 %v2110_v44 }
  0xd5   : >> { %1146 = vmatpush.msra.mxu3 %v2109_v45  ;;  %812 = vmatpush.msra.mxu0 %v2110_v44 }
  0xd6   : >> { %1149 = vmatpush.msra.mxu2 %v2111_v43 }
  0xd7   : >> { %1148 = vmatpush.msra.mxu3 %v2110_v44  ;;  %813 = vmatpush.msra.mxu0 %v2111_v43 }
  0xd9   : >> { %1150 = vmatpush.msra.mxu3 %v2111_v43 }
  0xdb   : >> { %1151 = vmatpush.msrb.mxu3 %v2112_v15 }
  0xdd   : >> { %1152 = vmatpush.msrb.mxu3 %v2113_v14 }
  0xdf   : >> { %1153 = vmatpush.msrb.mxu3 %v2114_v9 }
  0xe1   : >> { %1154 = vmatpush.msrb.mxu3 %v2115_v8 }
 0x127   : >> { %v629_v39 = vpop.xlane.xlu0 %628  ;;  %v631_v57 = vpop.xlane.xlu1 %630 }
 0x128   : >> { %vm641_vm2 = vcmp.eq.f32.partialorder %v1432_v23, %v629_v39  ;;  %vm642_vm4 = vcmp.eq.f32.partialorder %v1428_v17, %v631_v57  ;;  %v633_v63 = vpop.xlane.xlu2 %632 }
 0x129   : >> { %v649_v0 = vsel %vm641_vm2, %v1587_v30, 128  ;;  %v650_v1 = vsel %vm642_vm4, %v1587_v30, 128  ;;  %vm643_vm7 = vcmp.eq.f32.partialorder %v1424_v41, %v633_v63 }
 0x12a   : >> { %v697_v5 = vshra.s32 %v649_v0, 16  ;;  %v711_v6 = vshra.s32 %v650_v1, 16  ;;  %v651_v32 = vsel %vm643_vm7, %v1587_v30, 128  ;;  %v710_v7 = vand.u32 65535, %v650_v1 }
 0x12c   : >> { %v699_v10 = vcvt.s32.f32 %v697_v5  ;;  %v713_v26 = vcvt.s32.f32 %v711_v6  ;;  %v725_v6 = vshra.s32 %v651_v32, 16  ;;  %v712_v9 = vcvt.s32.f32 %v710_v7 }
 0x12e   : >> { %700 = vmin.xlane.f32.xlu2 %v699_v10  ;;  %714 = vmin.xlane.f32.xlu1 %v713_v26  ;;  %v727_v2 = vcvt.s32.f32 %v725_v6 }
 0x132   : >> { %v623_v11 = vpop.xlane.xlu0 %622 }
 0x133   : >> { %v625_v13 = vpop.xlane.xlu1 %624  ;;  %vm638_vm5 = vcmp.eq.f32.partialorder %v1444_v50, %v623_v11 }
 0x134   : >> { %vm639_vm6 = vcmp.eq.f32.partialorder %v1440_v22, %v625_v13  ;;  %v627_v19 = vpop.xlane.xlu2 %626  ;;  %v646_v20 = vsel %vm638_vm5, %v1587_v30, 128 }
 0x135   : >> { %v647_v21 = vsel %vm639_vm6, %v1587_v30, 128  ;;  %vm640_vm8 = vcmp.eq.f32.partialorder %v1436_v58, %v627_v19  ;;  %v655_v27 = vshra.s32 %v646_v20, 16  ;;  %v654_v6 = vand.u32 65535, %v646_v20 }
 0x136   : >> { %v669_v28 = vshra.s32 %v647_v21, 16  ;;  %v648_v29 = vsel %vm640_vm8, %v1587_v30, 128 }
 0x137   : >> { %v683_v33 = vshra.s32 %v648_v29, 16  ;;  %v657_v57 = vcvt.s32.f32 %v655_v27  ;;  %v682_v43 = vand.u32 65535, %v648_v29  ;;  %v656_v44 = vcvt.s32.f32 %v654_v6 }
 0x138   : >> { %v671_v39 = vcvt.s32.f32 %v669_v28 }
 0x139   : >> { %v685_v5 = vcvt.s32.f32 %v683_v33  ;;  %658 = vmin.xlane.f32.xlu0 %v657_v57  ;;  %v696_v33 = vand.u32 65535, %v649_v0  ;;  %v684_v48 = vcvt.s32.f32 %v682_v43 }
 0x13a   : >> { %672 = vmin.xlane.f32.xlu2 %v671_v39  ;;  %v635_v63 = vpop.xlane.xlu0 %634 }
 0x13b   : >> { %v637_v11 = vpop.xlane.xlu1 %636  ;;  %686 = vmin.xlane.f32.xlu1 %v685_v5  ;;  %vm644_vm9 = vcmp.eq.f32.partialorder %v1420_v18, %v635_v63  ;;  %v698_v8 = vcvt.s32.f32 %v696_v33 }
 0x13c   : >> { %v652_v13 = vsel %vm644_vm9, %v1587_v30, 128  ;;  %vm645_vm10 = vcmp.eq.f32.partialorder %v1416_v35, %v637_v11 }
 0x13d   : >> { %v739_v19 = vshra.s32 %v652_v13, 16  ;;  %v653_v4 = vsel %vm645_vm10, %v1587_v30, 128 }
 0x13e   : >> { %v753_v27 = vshra.s32 %v653_v4, 16 }
 0x13f   : >> { %v741_v3 = vcvt.s32.f32 %v739_v19  ;;  %v668_v19 = vand.u32 65535, %v647_v21 }
 0x140   : >> { %v755_v28 = vcvt.s32.f32 %v753_v27 }
 0x141   : >> { %728 = vmin.xlane.f32.xlu0 %v727_v2  ;;  %v670_v45 = vcvt.s32.f32 %v668_v19 }
 0x142   : >> { %742 = vmin.xlane.f32.xlu2 %v741_v3 }
 0x149   : >> { %756 = vmin.xlane.f32.xlu0 %v755_v28 }
 0x1a1   : >> { %v701_v14 = vpop.xlane.xlu2 %700  ;;  %v715_v63 = vpop.xlane.xlu1 %714 }
 0x1a2   : >> { %vm702_vm11 = vcmp.eq.f32.partialorder %v699_v10, %v701_v14  ;;  %vm716_vm12 = vcmp.eq.f32.partialorder %v713_v26, %v715_v63 }
 0x1a3   : >> { %v703_v15 = vsel %vm702_vm11, %v698_v8, inf  ;;  %v717_v11 = vsel %vm716_vm12, %v712_v9, inf  ;;  %v724_v9 = vand.u32 65535, %v651_v32  ;;  %v721_v32 = vcvt.f32.s32 %v715_v63 }
 0x1a4   : >> { %704 = vmin.xlane.f32.xlu1 %v703_v15  ;;  %718 = vmin.xlane.f32.xlu0 %v717_v11  ;;  %v738_v15 = vand.u32 65535, %v652_v13 }
 0x1a5   : >> { %v726_v10 = vcvt.s32.f32 %v724_v9  ;;  %v722_v11 = vshll.u32 %v721_v32, 16 }
 0x1a6   : >> { %v740_v26 = vcvt.s32.f32 %v738_v15 }
 0x1ac   : >> { %v659_v27 = vpop.xlane.xlu0 %658 }
 0x1ad   : >> { %v673_v47 = vpop.xlane.xlu2 %672  ;;  %vm660_vm13 = vcmp.eq.f32.partialorder %v657_v57, %v659_v27 }
 0x1ae   : >> { %v687_v0 = vpop.xlane.xlu1 %686  ;;  %vm674_vm14 = vcmp.eq.f32.partialorder %v671_v39, %v673_v47  ;;  %v661_v7 = vsel %vm660_vm13, %v656_v44, inf  ;;  %v752_v39 = vand.u32 65535, %v653_v4 }
 0x1af   : >> { %v675_v1 = vsel %vm674_vm14, %v670_v45, inf  ;;  %vm688_vm15 = vcmp.eq.f32.partialorder %v685_v5, %v687_v0  ;;  %662 = vmin.xlane.f32.xlu2 %v661_v7  ;;  %v679_v7 = vcvt.f32.s32 %v673_v47  ;;  %v693_v4 = vcvt.f32.s32 %v687_v0 }
 0x1b0   : >> { %676 = vmin.xlane.f32.xlu1 %v675_v1  ;;  %v689_v8 = vsel %vm688_vm15, %v684_v48, inf  ;;  %v754_v44 = vcvt.s32.f32 %v752_v39  ;;  %v707_v48 = vcvt.f32.s32 %v701_v14  ;;  %v665_v1 = vcvt.f32.s32 %v659_v27 }
 0x1b1   : >> { %690 = vmin.xlane.f32.xlu0 %v689_v8  ;;  %v1451_v14 = vmov 1.0   ;;  %v680_v8 = vshll.u32 %v679_v7, 16 }
 0x1b2   : >> { %v708_v33 = vshll.u32 %v707_v48, 16  ;;  %v666_v47 = vshll.u32 %v665_v1, 16 }
 0x1b4   : >> { %v729_v21 = vpop.xlane.xlu0 %728 }
 0x1b5   : >> { %v743_v20 = vpop.xlane.xlu2 %742  ;;  %vm730_vm1 = vcmp.eq.f32.partialorder %v727_v2, %v729_v21 }
 0x1b6   : >> { %vm744_vm3 = vcmp.eq.f32.partialorder %v741_v3, %v743_v20  ;;  %v731_v29 = vsel %vm730_vm1, %v726_v10, inf  ;;  %v694_v10 = vshll.u32 %v693_v4, 16  ;;  %v749_v39 = vcvt.f32.s32 %v743_v20 }
 0x1b7   : >> { %v745_v43 = vsel %vm744_vm3, %v740_v26, inf  ;;  %732 = vmin.xlane.f32.xlu2 %v731_v29 }
 0x1b8   : >> { %746 = vmin.xlane.f32.xlu1 %v745_v43 }
 0x1bc   : >> { %v757_v45 = vpop.xlane.xlu0 %756 }
 0x1bd   : >> { %vm758_vm2 = vcmp.eq.f32.partialorder %v755_v28, %v757_v45 }
 0x1be   : >> { %v759_v57 = vsel %vm758_vm2, %v754_v44, inf  ;;  %v735_v44 = vcvt.f32.s32 %v729_v21 }
 0x1bf   : >> { %760 = vmin.xlane.f32.xlu2 %v759_v57  ;;  %v750_v57 = vshll.u32 %v749_v39, 16 }
 0x1c0   : >> { %v736_v48 = vshll.u32 %v735_v44, 16 }
 0x217   : >> { %v719_v5 = vpop.xlane.xlu0 %718  ;;  %v705_v13 = vpop.xlane.xlu1 %704 }
 0x218   : >> { %v720_v6 = vcvt.f32.s32 %v719_v5  ;;  %v706_v19 = vcvt.f32.s32 %v705_v13 }
 0x21a   : >> { %v709_v2 = vadd.s32 %v708_v33, %v706_v19  ;;  %v723_v3 = vadd.s32 %v722_v11, %v720_v6  ;;  %v763_v11 = vcvt.f32.s32 %v757_v45 }
 0x21c   : >> { %vm769_vm4 = vcmp.eq.s32.totalorder %v1587_v30, %v709_v2  ;;  %vm770_vm5 = vcmp.eq.s32.totalorder %v1587_v30, %v723_v3  ;;  %v764_v19 = vshll.u32 %v763_v11, 16 }
 0x21d   : >> { %v1954_v23 = vsel %vm769_vm4, inf, %v1432_v23   ;;  %1096 = vmatmul.msk.f32.vlgmr.msra.gmra.mxu2 %vm769_vm4, %v1451_v14  ;;  %v1959_v17 = vsel %vm770_vm5, inf, %v1428_v17  }
 0x222   : >> { %v663_v28 = vpop.xlane.xlu2 %662 }
 0x223   : >> { %v677_v63 = vpop.xlane.xlu1 %676  ;;  %v664_v27 = vcvt.f32.s32 %v663_v28 }
 0x224   : >> { %v691_v9 = vpop.xlane.xlu0 %690  ;;  %v678_v15 = vcvt.f32.s32 %v677_v63 }
 0x225   : >> { %v692_v26 = vcvt.f32.s32 %v691_v9  ;;  %v667_v0 = vadd.s32 %v666_v47, %v664_v27  ;;  %1097 = vmatmul.msk.f32.gmra.mxu2 %vm770_vm5, %v1451_v14 }
 0x226   : >> { %v681_v29 = vadd.s32 %v680_v8, %v678_v15 }
 0x227   : >> { %v695_v43 = vadd.s32 %v694_v10, %v692_v26  ;;  %vm766_vm6 = vcmp.eq.s32.totalorder %v1587_v30, %v667_v0 }
 0x228   : >> { %vm767_vm7 = vcmp.eq.s32.totalorder %v1587_v30, %v681_v29  ;;  %v1964_v50 = vsel %vm766_vm6, inf, %v1444_v50   ;;  %1093 = vmatmul.msk.f32.vlgmr.msra.gmra.mxu0 %vm766_vm6, %v1451_v14 }
 0x229   : >> { %v1971_v22 = vsel %vm767_vm7, inf, %v1440_v22   ;;  %vm768_vm8 = vcmp.eq.s32.totalorder %v1587_v30, %v695_v43 }
 0x22a   : >> { %v1977_v58 = vsel %vm768_vm8, inf, %v1436_v58   ;;  %v733_v20 = vpop.xlane.xlu2 %732 }
 0x22b   : >> { %v747_v21 = vpop.xlane.xlu1 %746  ;;  %v734_v32 = vcvt.f32.s32 %v733_v20 }
 0x22c   : >> { %v748_v5 = vcvt.f32.s32 %v747_v21 }
 0x22d   : >> { %v737_v33 = vadd.s32 %v736_v48, %v734_v32 }
 0x22e   : >> { %v751_v13 = vadd.s32 %v750_v57, %v748_v5 }
 0x22f   : >> { %vm771_vm9 = vcmp.eq.s32.totalorder %v1587_v30, %v737_v33 }
 0x230   : >> { %vm772_vm10 = vcmp.eq.s32.totalorder %v1587_v30, %v751_v13  ;;  %1094 = vmatmul.msk.f32.gmra.mxu0 %vm767_vm7, %v1451_v14  ;;  %v779_v41 = vsel %vm771_vm9, inf, %v1424_v41   ;;  %1098 = vmatmul.msk.f32.gmra.mxu2 %vm771_vm9, %v1451_v14 }
 0x231   : >> { %v780_v18 = vsel %vm772_vm10, inf, %v1420_v18  }
 0x232   : >> { %v761_v6 = vpop.xlane.xlu2 %760 }
 0x233   : >> { %v762_v2 = vcvt.f32.s32 %v761_v6 }
 0x235   : >> { %v765_v3 = vadd.s32 %v764_v19, %v762_v2 }
 0x237   : >> { %vm773_vm11 = vcmp.eq.s32.totalorder %v1587_v30, %v765_v3 }
 0x238   : >> { %1095 = vmatmul.msk.f32.gmra.mxu0 %vm768_vm8, %v1451_v14  ;;  %1099 = vmatmul.msk.f32.gmra.mxu2 %vm772_vm10, %v1451_v14  ;;  %v781_v35 = vsel %vm773_vm11, inf, %v1416_v35  }
 0x239   : >> { %1100 = vmatmul.msk.f32.vlgmr.msra.gmra.mxu3 %vm773_vm11, %v1451_v14 }
 0x2a0   : >> { %v824_v45 = vpop.f32.mrf.mxu2 }
 0x2a5   : >> { %v815_v7 = vpop.f32.mrf.mxu0 }
 0x2a6   : >> { %1101 = vmatmul.msk.f32.vlgmr.msra.gmra.mxu1 %vm347_vm0, %v815_v7 }
 0x2a8   : >> { %v827_v1 = vpop.f32.mrf.mxu2 }
 0x2ad   : >> { %v818_v4 = vpop.f32.mrf.mxu0 }
 0x2ae   : >> { %1102 = vmatmul.msk.f32.gmra.mxu1 %vm347_vm0, %v818_v4 }
 0x2b3   : >> { %v830_v28 = vpop.f32.mrf.mxu2 }
 0x2b5   : >> { %v821_v63 = vpop.f32.mrf.mxu0 }
 0x2b6   : >> { %1103 = vmatmul.msk.f32.gmra.mxu1 %vm347_vm0, %v821_v63 }
 0x2bb   : >> { %v833_v8 = vpop.f32.mrf.mxu2 }
 0x2bc   : >> { %1107 = vmatmul.msk.f32.vlgmr.msrb.gmra.mxu3 %vm347_vm0, %v833_v8  ;;  %v836_v47 = vpop.f32.mrf.mxu3 }
 0x2be   : >> { %1104 = vmatmul.msk.f32.gmra.mxu1 %vm347_vm0, %v824_v45 }
 0x2c4   : >> { %1108 = vmatmul.msk.f32.gmra.mxu3 %vm347_vm0, %v836_v47 }
 0x2c6   : >> { %1105 = vmatmul.msk.f32.gmra.mxu1 %vm347_vm0, %v827_v1 }
 0x2ce   : >> { %1106 = vmatmul.msk.f32.gmra.mxu1 %vm347_vm0, %v830_v28 }
 0x323   : >> { %v880_v14 = vpop.f32.mrf.mxu1 }
 0x324   : >> { %v904_v27 = vmax.f32 %v1412_v53, %v880_v14  }
 0x326   : >> { %v2128_v53 = vmov %v904_v27  ;;  %v912_v5 = vadd.f32 (%p2006_p4), %v904_v27, %v1648_v52 }
 0x328   : > { %v920_v19 = vmax.f32 (%p2006_p4), %v912_v5, 0.0 }
 0x32a   : > { %928 = vst [vmem:[%s1536_s30] sm:$0xff] (%p2006_p4), %v920_v19 }
 0x32b   : >> { %v883_v9 = vpop.f32.mrf.mxu1 }
 0x32c   : >> { %v905_v15 = vmax.f32 %v1408_v51, %v883_v9  }
 0x32e   : >> { %v2127_v51 = vmov %v905_v15  ;;  %v913_v13 = vadd.f32 (%p2006_p4), %v905_v15, %v1743_v24 }
 0x330   : > { %v921_v30 = vmax.f32 (%p2006_p4), %v913_v13, 0.0 }
 0x332   : > { %929 = vst [vmem:[%s1536_s30 + $0x8] sm:$0xff] (%p2006_p4), %v921_v30 }
 0x333   : >> { %v886_v10 = vpop.f32.mrf.mxu1 }
 0x334   : >> { %v906_v26 = vmax.f32 %v1404_v31, %v886_v10  }
 0x336   : >> { %v2126_v31 = vmov %v906_v26  ;;  %v914_v33 = vadd.f32 (%p2006_p4), %v906_v26, %v1760_v62 }
 0x338   : > { %v922_v49 = vmax.f32 (%p2006_p4), %v914_v33, 0.0 }
 0x33a   : > { %930 = vst [vmem:[%s1536_s30 + $0x10] sm:$0xff] (%p2006_p4), %v922_v49 }
 0x33b   : >> { %v889_v0 = vpop.f32.mrf.mxu1 }
 0x33c   : >> { %v907_v29 = vmax.f32 %v1400_v46, %v889_v0  }
 0x33e   : >> { %v2125_v46 = vmov %v907_v29  ;;  %v915_v11 = vadd.f32 (%p2006_p4), %v907_v29, %v1775_v25 }
 0x33f   : >> { %v898_v43 = vpop.f32.mrf.mxu3 }
 0x340   : >> { %v910_v39 = vmax.f32 %v1388_v37, %v898_v43   ;;  %v923_v54 = vmax.f32 (%p2006_p4), %v915_v11, 0.0 }
 0x342   : >> { %v2122_v37 = vmov %v910_v39  ;;  %v918_v52 = vadd.f32 (%p2006_p4), %v910_v39, %v1769_v16  ;;  %931 = vst [vmem:[%s1536_s30 + $0x18] sm:$0xff] (%p2006_p4), %v923_v54 }
 0x343   : >> { %v892_v44 = vpop.f32.mrf.mxu1 }
 0x344   : >> { %v908_v20 = vmax.f32 %v1396_v42, %v892_v44   ;;  %v926_v60 = vmax.f32 (%p2006_p4), %v918_v52, 0.0 }
 0x346   : >> { %v2124_v42 = vmov %v908_v20  ;;  %v916_v6 = vadd.f32 (%p2006_p4), %v908_v20, %v1715_v12  ;;  %934 = vst [vmem:[%s1536_s30 + $0x30] sm:$0xff] (%p2006_p4), %v926_v60 }
 0x347   : >> { %v901_v21 = vpop.f32.mrf.mxu3 }
 0x348   : >> { %v911_v57 = vmax.f32 %v1384_v36, %v901_v21   ;;  %v924_v56 = vmax.f32 (%p2006_p4), %v916_v6, 0.0 }
 0x34a   : >> { %v2121_v36 = vmov %v911_v57  ;;  %604 = sbr.rel (!%p2006_p4) target bundleno = 180 (0xb4), region = 92  ;;  %v919_v55 = vadd.f32 (%p2006_p4), %v911_v57, %v1781_v34  ;;  %932 = vst [vmem:[%s1536_s30 + $0x20] sm:$0xff] (%p2006_p4), %v924_v56 }
 0x34b   : >> { %v895_v48 = vpop.f32.mrf.mxu1 }
 0x34c   : >> { %v909_v32 = vmax.f32 %v1392_v40, %v895_v48   ;;  %v927_v61 = vmax.f32 (%p2006_p4), %v919_v55, 0.0 }
 0x34e   : >> { %v2123_v40 = vmov %v909_v32  ;;  %v917_v50 = vadd.f32 (%p2006_p4), %v909_v32, %v1752_v38  ;;  %935 = vst [vmem:[%s1536_s30 + $0x38] sm:$0xff] (%p2006_p4), %v927_v61 }
 0x350   : > { %v925_v59 = vmax.f32 %v917_v50, 0.0 }
 0x352   : > { %933 = vst [vmem:[%s1536_s30 + $0x28] sm:$0xff] %v925_v59 }
 0x353 PF: > { %s18_s27 = sadd.s32 1, %s1380_s27  }
 0x354   : > { %p15_p5 = scmp.ge.s32.totalorder %s18_s27, 4  }
 0x356   :  { %17 = sbr.rel (!%p15_p5) target bundleno = 1 (0x1), region = 103 }

</bundles_post_ra>
